<compile_context>
chip_gen: v5e
topology: v5e:2x2
jax: 0.10.0
libtpu: 0.0.40
codegen_flags: <defaults>
</compile_context>

<pallas_src>
import functools

import jax
import jax.numpy as jnp
from jax import lax
from jax.experimental import pallas as pl
from jax.experimental.pallas import tpu as pltpu


# ----------------------------------------------------------------------------
# Per-generation tuning: VMEM budgets and megacore-awareness.
# ----------------------------------------------------------------------------
@functools.lru_cache(maxsize=1)
def _generation_config():
    try:
        kind = jax.devices()[0].device_kind.lower()
    except Exception:
        kind = ""
    if "v5 lite" in kind or "v5e" in kind or "v5lite" in kind:
        # 128 MiB physical VMEM, 1 TensorCore, default scoped limit only 16 MiB.
        return dict(name="v5e", vmem_limit=100 << 20, budget=64 << 20, two_cores=False)
    if "v6" in kind:
        # 128 MiB physical VMEM, 1 TensorCore, default scoped limit 32 MiB.
        return dict(name="v6e", vmem_limit=100 << 20, budget=64 << 20, two_cores=False)
    if "7" in kind:
        # 64 MiB physical VMEM per TC, 2 TensorCores/chip (megacore sharding).
        return dict(name="v7x", vmem_limit=48 << 20, budget=28 << 20, two_cores=True)
    # Unknown / older generations (v4, v5p): conservative VMEM, assume megacore.
    return dict(name="unknown", vmem_limit=48 << 20, budget=28 << 20, two_cores=True)


def _largest_divisor_leq(n, cap):
    cap = max(1, min(n, cap))
    for d in range(cap, 0, -1):
        if n % d == 0:
            return d
    return 1


# ----------------------------------------------------------------------------
# Fused Q/K/V projection (1x1 Conv1d == per-position linear), length-tiled.
# ----------------------------------------------------------------------------
def _choose_len_tile(N, cap=1024):
    """Lane-dense tile for the projection length axis."""
    if N <= cap:
        return N
    for t in (1024, 512, 256):
        if N % t == 0:
            return t
    return 512  # multiple of 128; the final partial block is masked by Pallas


def _qkv_proj_kernel(xq_ref, xk_ref, xv_ref, w_ref, b_ref,
                     qo_ref, ko_ref, vo_ref):
    """General (cross-attention) path: three (C,C) @ (C,TN) dots."""
    C = xq_ref.shape[1]
    for idx, (x_ref, o_ref) in enumerate(((xq_ref, qo_ref),
                                          (xk_ref, ko_ref),
                                          (xv_ref, vo_ref))):
        w = w_ref[idx * C:(idx + 1) * C, :]
        b = b_ref[idx * C:(idx + 1) * C, :]
        y = jnp.dot(w, x_ref[0], preferred_element_type=jnp.float32)
        o_ref[0] = (y + b).astype(o_ref.dtype)


def _qkv_proj_self_kernel(x_ref, w_ref, b_ref, qo_ref, ko_ref, vo_ref):
    """Self-attention path: one (3C, C) @ (C, TN) MXU dot for Q, K and V."""
    C = x_ref.shape[1]
    y = jnp.dot(w_ref[...], x_ref[0], preferred_element_type=jnp.float32)  # (3C, TN)
    for idx, o_ref in enumerate((qo_ref, ko_ref, vo_ref)):
        o_ref[0] = (y[idx * C:(idx + 1) * C, :]
                    + b_ref[idx * C:(idx + 1) * C, :]).astype(o_ref.dtype)


def qkv_project(xq, xk, xv, w3, b3, *, self_attention=False):
    """xq/xk/xv: (B, C, N); w3: (3C, C); b3: (3C, 1) -> 3 x (B, C, N)."""
    B, C, N = xq.shape
    TN = _choose_len_tile(N)
    grid = (B, pl.cdiv(N, TN))
    cfg = _generation_config()

    x_spec = pl.BlockSpec((1, C, TN), lambda b, n: (b, 0, n))
    w_spec = pl.BlockSpec((3 * C, C), lambda b, n: (0, 0))
    b_spec = pl.BlockSpec((3 * C, 1), lambda b, n: (0, 0))
    out_shape = tuple(jax.ShapeDtypeStruct((B, C, N), xq.dtype) for _ in range(3))
    out_specs = [x_spec, x_spec, x_spec]
    cp = pltpu.CompilerParams(dimension_semantics=("parallel", "parallel"),
                              vmem_limit_bytes=cfg["vmem_limit"])

    if self_attention:
        return pl.pallas_call(
            _qkv_proj_self_kernel,
            out_shape=out_shape,
            grid_spec=pltpu.PrefetchScalarGridSpec(
                num_scalar_prefetch=0, grid=grid,
                in_specs=[x_spec, w_spec, b_spec], out_specs=out_specs),
            compiler_params=cp,
        )(xq, w3, b3)

    return pl.pallas_call(
        _qkv_proj_kernel,
        out_shape=out_shape,
        grid_spec=pltpu.PrefetchScalarGridSpec(
            num_scalar_prefetch=0, grid=grid,
            in_specs=[x_spec, x_spec, x_spec, w_spec, b_spec],
            out_specs=out_specs),
        compiler_params=cp,
    )(xq, xk, xv, w3, b3)


# ----------------------------------------------------------------------------
# Attention core with the merge 1x1 conv fused into the epilogue.
#   scores = q'^T k   (scale pre-folded into q');  prob = softmax(scores, -1)
#   ctx    = v @ prob^T    (deferred normalization, no prob^T materialized)
#   out    = W_merge @ concat_heads(ctx) + b_merge
# ----------------------------------------------------------------------------
def _attention_merge_kernel(q_ref, k_ref, v_ref, wm_ref, bm_ref, o_ref,
                            *prob_ref, num_heads, use_bf16, return_prob):
    G = q_ref.shape[0]
    GB = G // num_heads
    dot_dtype = jnp.bfloat16 if use_bf16 else q_ref.dtype

    # scores[g, t, m] = sum_d q[g, d, t] * k[g, d, m]
    # (operands cast to bf16 right at the MXU op; accumulation stays f32;
    #  softmax reduce stays on the lane axis.)
    q = q_ref[...].astype(dot_dtype)
    k = k_ref[...].astype(dot_dtype)
    scores = lax.dot_general(q, k, (((1,), (1,)), ((0,), (0,))),
                             preferred_element_type=jnp.float32)   # (G, TQ, N)

    m = jnp.max(scores, axis=-1, keepdims=True)
    e = jnp.exp(scores - m)                                        # (G, TQ, N) f32
    s = jnp.sum(e, axis=-1)                                        # (G, TQ)

    if return_prob:
        inv = 1.0 / s                      # exact reciprocal on the debug path
        prob_ref[0][...] = (e * inv[:, :, None]).astype(prob_ref[0].dtype)
    else:
        inv = pl.reciprocal(s, approx=True)        # EUP slot, effectively free

    # Deferred normalization: scale the (dim, TQ) context instead of the
    # (TQ, N) prob matrix.  out[g,d,t] = (sum_m v[g,d,m] * e[g,t,m]) * inv[g,t]
    ctx = lax.dot_general(v_ref[...].astype(dot_dtype), e.astype(dot_dtype),
                          (((2,), (2,)), ((0,), (0,))),
                          preferred_element_type=jnp.float32)      # (G, dim, TQ)
    ctx = (ctx * inv[:, None, :]).astype(dot_dtype)

    # Fused merge 1x1 conv: channels are head-major, so the merge weight is
    # pre-split per head (H, d_model, dim) and applied as a batched dot + sum
    # over heads (no in-kernel reshape/relayout of the head outputs).
    wm = wm_ref[...].astype(dot_dtype)
    bm = bm_ref[...]
    for g in range(GB):                    # GB is small & static -> unrolled
        heads = ctx[g * num_heads:(g + 1) * num_heads]             # (H, dim, TQ)
        y = lax.dot_general(wm, heads, (((2,), (1,)), ((0,), (0,))),
                            preferred_element_type=jnp.float32)    # (H, d_model, TQ)
        o_ref[g] = (jnp.sum(y, axis=0) + bm).astype(o_ref.dtype)


def _choose_attention_blocks(B, H, dim, d_model, N, itemsize, return_prob,
                             prob_itemsize, cfg):
    """Pick (G = GB*H, TQ) so the per-step working set fits the VMEM budget,
    accounting for double-buffering, the prob output and in-kernel temporaries."""
    budget = cfg["budget"]
    if N <= 512:
        tq_cands = [N]
    else:
        tq_cands = [t for t in (512, 384, 256, 128) if N % t == 0]
        if not tq_cands:
            # N not a multiple of 128: lane-dense tiles with a masked final
            # partial block beat a full-N score slab.
            tq_cands = [512, 256, 128]

    def step_bytes(G, TQ):
        GB = G // H
        dbl = 2  # Pallas double-buffers every DMA'd block
        io = dbl * itemsize * (G * dim * TQ + 2 * G * dim * N + GB * d_model * TQ)
        io += dbl * 4 * (H * d_model * dim + d_model)     # merge weight + bias
        if return_prob:
            io += dbl * prob_itemsize * G * TQ * N
        tmp = (G * TQ * N * 6                 # f32 scores + bf16 exp slab
               + G * dim * (2 * N + TQ) * 2   # bf16 operand copies
               + GB * d_model * TQ * 8)       # merge accumulators
        return io + tmp

    for TQ in tq_cands:
        n_qtiles = pl.cdiv(N, TQ)
        gb_cap = B
        if cfg["two_cores"] and n_qtiles < 2:
            # v7x megacore: keep >=2 parallel grid steps so both TensorCores
            # get work; on single-core v5e/v6e this cap is waived.
            gb_cap = max(1, B // 2)
        gb = _largest_divisor_leq(B, gb_cap)
        while True:
            if step_bytes(gb * H, TQ) <= budget:
                return gb * H, TQ
            if gb == 1:
                break
            gb = _largest_divisor_leq(B, gb - 1)
    # Nothing fits the budget (very large N): take the smallest blocks and
    # rely on the raised vmem_limit.
    # TODO(synk): flash-style key tiling (online softmax over a TK grid axis)
    # to bound VMEM independently of N (needed on v7x for N >~ 4-8K).
    return H, tq_cands[-1]


def attention_merge_pallas(q, k, v, wm, bm, num_heads, *, return_prob=False,
                           use_bf16=True):
    """q/k/v: (B*H, dim, N); wm: (H, d_model, dim); bm: (d_model, 1).
    Returns out: (B, d_model, N) [, prob: (B*H, N, N)]."""
    BH, dim, N = q.shape
    H = num_heads
    assert BH % H == 0
    B = BH // H
    d_model = H * dim
    cfg = _generation_config()
    itemsize = q.dtype.itemsize
    prob_dtype = q.dtype

    G, TQ = _choose_attention_blocks(B, H, dim, d_model, N, itemsize,
                                     return_prob, prob_dtype.itemsize, cfg)
    GB = G // H
    grid = (B // GB, pl.cdiv(N, TQ))

    kernel = functools.partial(_attention_merge_kernel, num_heads=H,
                               use_bf16=use_bf16, return_prob=return_prob)

    in_specs = [
        pl.BlockSpec((G, dim, TQ), lambda i, j: (i, 0, j)),        # q (query-tiled)
        pl.BlockSpec((G, dim, N), lambda i, j: (i, 0, 0)),         # k (resident over j)
        pl.BlockSpec((G, dim, N), lambda i, j: (i, 0, 0)),         # v
        pl.BlockSpec((H, d_model, dim), lambda i, j: (0, 0, 0)),   # merge W (per head)
        pl.BlockSpec((d_model, 1), lambda i, j: (0, 0)),           # merge bias
    ]
    out_spec = pl.BlockSpec((GB, d_model, TQ), lambda i, j: (i, 0, j))
    if return_prob:
        out_shape = (jax.ShapeDtypeStruct((B, d_model, N), q.dtype),
                     jax.ShapeDtypeStruct((BH, N, N), prob_dtype))
        out_specs = [out_spec, pl.BlockSpec((G, TQ, N), lambda i, j: (i, j, 0))]
    else:
        out_shape = jax.ShapeDtypeStruct((B, d_model, N), q.dtype)
        out_specs = out_spec

    in_bytes = itemsize * 3 * BH * dim * N + 4 * (H * d_model * dim + d_model)
    out_bytes = itemsize * B * d_model * N
    if return_prob:
        out_bytes += prob_dtype.itemsize * BH * N * N
    cost = pl.CostEstimate(
        flops=4 * BH * N * N * dim + 2 * B * N * d_model * d_model,
        transcendentals=BH * N * N,
        bytes_accessed=int(in_bytes + out_bytes),
    )

    return pl.pallas_call(
        kernel,
        out_shape=out_shape,
        grid_spec=pltpu.PrefetchScalarGridSpec(
            num_scalar_prefetch=0,
            grid=grid,
            in_specs=in_specs,
            out_specs=out_specs,
        ),
        compiler_params=pltpu.CompilerParams(
            dimension_semantics=("parallel", "parallel"),
            vmem_limit_bytes=cfg["vmem_limit"]),
        cost_estimate=cost,
    )(q, k, v, wm, bm)


# ----------------------------------------------------------------------------
# Parameters
# ----------------------------------------------------------------------------
def init_params(key, d_model):
    """Deterministic params mimicking nn.Conv1d(d_model, d_model, 1) x 4."""
    keys = jax.random.split(key, 8)
    bound = 1.0 / (d_model ** 0.5)      # kernel_size = 1

    def conv_params(kw, kb):
        w = jax.random.uniform(kw, (d_model, d_model), jnp.float32, -bound, bound)
        b = jax.random.uniform(kb, (d_model,), jnp.float32, -bound, bound)
        return w, b

    proj = [conv_params(keys[2 * i], keys[2 * i + 1]) for i in range(3)]
    merge = conv_params(keys[6], keys[7])
    return {"proj": proj, "merge": merge}


def _head_major_permutation(d_model, num_heads):
    # PyTorch's .view(B, dim, H, N) maps channel c -> (d = c // H, h = c % H).
    # perm[h*dim + d] = d*H + h reorders channels to head-major (h, d) order.
    dim = d_model // num_heads
    return jnp.arange(d_model).reshape(dim, num_heads).T.reshape(-1)


def prepare_params(params, num_heads):
    """ONE-TIME weight prep (hoisted out of the forward path):
      - stack Q/K/V conv weights into a flat (3C, C) matrix, rows permuted to
        head-major channel order (head split becomes a free reshape),
      - fold the 1/sqrt(dim) attention scale into the Q weights/bias,
      - permute + split the merge conv weight per head: (H, d_model, dim)."""
    (wq, bq), (wk, bk), (wv, bv) = params["proj"]
    wm, bm = params["merge"]
    d_model = wq.shape[0]
    dim = d_model // num_heads
    scale = 1.0 / (dim ** 0.5)
    perm = _head_major_permutation(d_model, num_heads)

    w3 = jnp.concatenate([wq[perm] * scale, wk[perm], wv[perm]], axis=0)     # (3C, C)
    b3 = jnp.concatenate([bq[perm] * scale, bk[perm], bv[perm]])[:, None]    # (3C, 1)
    wm_h = wm[:, perm].reshape(d_model, num_heads, dim).transpose(1, 0, 2)   # (H, C, dim)
    return {"w3": w3, "b3": b3, "wm": wm_h, "bm": bm.reshape(d_model, 1)}


# ----------------------------------------------------------------------------
# MultiHeadedAttention forward
# ----------------------------------------------------------------------------
def multi_headed_attention(query, key, value, fused_params, num_heads,
                           return_prob=False, use_bf16=True):
    """query/key/value: (B, d_model, N) float32 (PyTorch Conv1d 'BCL' layout).
    `fused_params` must come from `prepare_params` (computed once)."""
    B, d_model, N = query.shape
    assert d_model % num_heads == 0, "d_model must be divisible by num_heads"
    H = num_heads
    dim = d_model // H
    w3, b3, wm, bm = (fused_params[n] for n in ("w3", "b3", "wm", "bm"))

    self_attn = (query is key) and (key is value)
    q, k, v = qkv_project(query, key, value, w3, b3, self_attention=self_attn)

    # Head-major projection channels -> free head split.
    qf = q.reshape(B * H, dim, N)
    kf = k.reshape(B * H, dim, N)
    vf = v.reshape(B * H, dim, N)

    if return_prob:
        out, prob = attention_merge_pallas(qf, kf, vf, wm, bm, H,
                                           return_prob=True, use_bf16=use_bf16)
        # TODO(synk): the PyTorch module appends prob to the never-initialized
        # attribute self.prob (stateful side effect); we return it instead.
        return out, prob.reshape(B, H, N, N)
    return attention_merge_pallas(qf, kf, vf, wm, bm, H, use_bf16=use_bf16)


# ----------------------------------------------------------------------------
# Pure-JAX reference for sanity checking (uses the original, unfused params)
# ----------------------------------------------------------------------------
def reference(query, key, value, params, num_heads):
    B, d_model, N = query.shape
    dim = d_model // num_heads
    H = num_heads

    def lin(x, w, b):
        return jnp.einsum("oc,bcn->bon", w, x) + b[None, :, None]

    q, k, v = (lin(x, w, b).reshape(B, dim, H, N)
               for (w, b), x in zip(params["proj"], (query, key, value)))
    scores = jnp.einsum("bdhn,bdhm->bhnm", q, k) / (dim ** 0.5)
    prob = jax.nn.softmax(scores, axis=-1)
    x = jnp.einsum("bhnm,bdhm->bdhn", prob, v)
    x = x.reshape(B, dim * H, N)
    return lin(x, *params["merge"]), prob


if __name__ == "__main__":
    B, d_model, N, H = 2, 32, 16, 4

    root = jax.random.PRNGKey(0)
    k_params, kq, kk, kv = jax.random.split(root, 4)
    params = init_params(k_params, d_model)
    fused = prepare_params(params, H)        # one-time weight prep (hoisted)

    query = jax.random.normal(kq, (B, d_model, N), jnp.float32)
    key = jax.random.normal(kk, (B, d_model, N), jnp.float32)
    value = jax.random.normal(kv, (B, d_model, N), jnp.float32)

    ref_out, ref_prob = reference(query, key, value, params, H)

    # Debug path: also emit softmax probabilities (exact normalization),
    # bf16 MXU operands -> slightly looser tolerance.
    out, prob = multi_headed_attention(query, key, value, fused, H,
                                       return_prob=True)
    out = jax.block_until_ready(out)
    prob = jax.block_until_ready(prob)
    assert out.shape == (B, d_model, N)
    assert prob.shape == (B, H, N, N)
    assert jnp.allclose(out, ref_out, rtol=5e-2, atol=5e-2)
    assert jnp.allclose(prob, ref_prob, rtol=2e-2, atol=2e-2)

    # Default fast path (bf16 matmul operands, no prob writeback).
    out_fast = jax.block_until_ready(
        multi_headed_attention(query, key, value, fused, H))
    assert out_fast.shape == (B, d_model, N)
    assert jnp.allclose(out_fast, ref_out, rtol=5e-2, atol=5e-2)

    # Full-f32 path: tight-tolerance check of the fused attention+merge kernel.
    out_f32 = jax.block_until_ready(
        multi_headed_attention(query, key, value, fused, H, use_bf16=False))
    assert jnp.allclose(out_f32, ref_out, rtol=2e-3, atol=2e-3)

    # Self-attention exercises the single-dot fused Q/K/V projection path.
    ref_self, _ = reference(query, query, query, params, H)
    out_self = jax.block_until_ready(
        multi_headed_attention(query, query, query, fused, H, use_bf16=False))
    assert jnp.allclose(out_self, ref_self, rtol=2e-3, atol=2e-3)

    print("KERNEL_OK")
</pallas_src>

<mosaic_0001>
module attributes {stable_mosaic.version = 11 : i64} {
  func.func @_qkv_proj_kernel(%arg0: i32, %arg1: i32, %arg2: memref<1x32x16xf32, #tpu.memory_space<vmem>>, %arg3: memref<1x32x16xf32, #tpu.memory_space<vmem>>, %arg4: memref<1x32x16xf32, #tpu.memory_space<vmem>>, %arg5: memref<96x32xf32, #tpu.memory_space<vmem>>, %arg6: memref<96x1xf32, #tpu.memory_space<vmem>>, %arg7: memref<1x32x16xf32, #tpu.memory_space<vmem>>, %arg8: memref<1x32x16xf32, #tpu.memory_space<vmem>>, %arg9: memref<1x32x16xf32, #tpu.memory_space<vmem>>) attributes {dimension_semantics = [#tpu.dimension_semantics<parallel>, #tpu.dimension_semantics<parallel>], iteration_bounds = array<i64: 2, 1>, scalar_prefetch = 0 : i64, scratch_operands = 0 : i64, tpu.core_type = #tpu.core_type<tc>, window_params = [{transform_indices = @transform_0, window_bounds = array<i64: 1, 32, 16>}, {transform_indices = @transform_1, window_bounds = array<i64: 1, 32, 16>}, {transform_indices = @transform_2, window_bounds = array<i64: 1, 32, 16>}, {pipeline_mode = #tpu.pipeline_mode<synchronous>, transform_indices = @transform_3, window_bounds = array<i64: 96, 32>}, {pipeline_mode = #tpu.pipeline_mode<synchronous>, transform_indices = @transform_4, window_bounds = array<i64: 96, 1>}, {transform_indices = @transform_5, window_bounds = array<i64: 1, 32, 16>}, {transform_indices = @transform_6, window_bounds = array<i64: 1, 32, 16>}, {transform_indices = @transform_7, window_bounds = array<i64: 1, 32, 16>}]} {
    %c0 = arith.constant 0 : index
    %c0_0 = arith.constant 0 : index
    %0 = vector.load %arg5[%c0, %c0_0] : memref<96x32xf32, #tpu.memory_space<vmem>>, vector<32x32xf32>
    %c0_1 = arith.constant 0 : index
    %c0_2 = arith.constant 0 : index
    %1 = vector.load %arg6[%c0_1, %c0_2] : memref<96x1xf32, #tpu.memory_space<vmem>>, vector<32x1xf32>
    %c0_3 = arith.constant 0 : index
    %c0_4 = arith.constant 0 : index
    %c0_5 = arith.constant 0 : index
    %2 = vector.load %arg2[%c0_3, %c0_4, %c0_5] : memref<1x32x16xf32, #tpu.memory_space<vmem>>, vector<1x32x16xf32>
    %3 = vector.shape_cast %2 : vector<1x32x16xf32> to vector<32x16xf32>
    %cst = arith.constant dense<0.000000e+00> : vector<32x16xf32>
    %4 = tpu.matmul %0, %3, %cst {dimension_numbers = #tpu.dot_dimension_numbers<[1], [0], [0], [1], [0, 0, 1, 1], [], []>} : vector<32x32xf32>, vector<32x16xf32>, vector<32x16xf32> -> vector<32x16xf32>
    %5 = vector.broadcast %1 : vector<32x1xf32> to vector<32x16xf32>
    %6 = arith.addf %4, %5 : vector<32x16xf32>
    %c0_6 = arith.constant 0 : index
    %c0_7 = arith.constant 0 : index
    %c0_8 = arith.constant 0 : index
    %7 = vector.load %arg7[%c0_6, %c0_7, %c0_8] : memref<1x32x16xf32, #tpu.memory_space<vmem>>, vector<1x32x16xf32>
    %8 = vector.shape_cast %7 : vector<1x32x16xf32> to vector<32x16xf32>
    %9 = vector.shape_cast %6 : vector<32x16xf32> to vector<1x32x16xf32>
    tpu.vector_store %arg7[%c0_6, %c0_7, %c0_8], %9 {strides = array<i32>} : memref<1x32x16xf32, #tpu.memory_space<vmem>>, vector<1x32x16xf32>,
    %c32 = arith.constant 32 : index
    %c0_9 = arith.constant 0 : index
    %10 = vector.load %arg5[%c32, %c0_9] : memref<96x32xf32, #tpu.memory_space<vmem>>, vector<32x32xf32>
    %c32_10 = arith.constant 32 : index
    %c0_11 = arith.constant 0 : index
    %11 = vector.load %arg6[%c32_10, %c0_11] : memref<96x1xf32, #tpu.memory_space<vmem>>, vector<32x1xf32>
    %c0_12 = arith.constant 0 : index
    %c0_13 = arith.constant 0 : index
    %c0_14 = arith.constant 0 : index
    %12 = vector.load %arg3[%c0_12, %c0_13, %c0_14] : memref<1x32x16xf32, #tpu.memory_space<vmem>>, vector<1x32x16xf32>
    %13 = vector.shape_cast %12 : vector<1x32x16xf32> to vector<32x16xf32>
    %cst_15 = arith.constant dense<0.000000e+00> : vector<32x16xf32>
    %14 = tpu.matmul %10, %13, %cst_15 {dimension_numbers = #tpu.dot_dimension_numbers<[1], [0], [0], [1], [0, 0, 1, 1], [], []>} : vector<32x32xf32>, vector<32x16xf32>, vector<32x16xf32> -> vector<32x16xf32>
    %15 = vector.broadcast %11 : vector<32x1xf32> to vector<32x16xf32>
    %16 = arith.addf %14, %15 : vector<32x16xf32>
    %c0_16 = arith.constant 0 : index
    %c0_17 = arith.constant 0 : index
    %c0_18 = arith.constant 0 : index
    %17 = vector.load %arg8[%c0_16, %c0_17, %c0_18] : memref<1x32x16xf32, #tpu.memory_space<vmem>>, vector<1x32x16xf32>
    %18 = vector.shape_cast %17 : vector<1x32x16xf32> to vector<32x16xf32>
    %19 = vector.shape_cast %16 : vector<32x16xf32> to vector<1x32x16xf32>
    tpu.vector_store %arg8[%c0_16, %c0_17, %c0_18], %19 {strides = array<i32>} : memref<1x32x16xf32, #tpu.memory_space<vmem>>, vector<1x32x16xf32>,
    %c64 = arith.constant 64 : index
    %c0_19 = arith.constant 0 : index
    %20 = vector.load %arg5[%c64, %c0_19] : memref<96x32xf32, #tpu.memory_space<vmem>>, vector<32x32xf32>
    %c64_20 = arith.constant 64 : index
    %c0_21 = arith.constant 0 : index
    %21 = vector.load %arg6[%c64_20, %c0_21] : memref<96x1xf32, #tpu.memory_space<vmem>>, vector<32x1xf32>
    %c0_22 = arith.constant 0 : index
    %c0_23 = arith.constant 0 : index
    %c0_24 = arith.constant 0 : index
    %22 = vector.load %arg4[%c0_22, %c0_23, %c0_24] : memref<1x32x16xf32, #tpu.memory_space<vmem>>, vector<1x32x16xf32>
    %23 = vector.shape_cast %22 : vector<1x32x16xf32> to vector<32x16xf32>
    %cst_25 = arith.constant dense<0.000000e+00> : vector<32x16xf32>
    %24 = tpu.matmul %20, %23, %cst_25 {dimension_numbers = #tpu.dot_dimension_numbers<[1], [0], [0], [1], [0, 0, 1, 1], [], []>} : vector<32x32xf32>, vector<32x16xf32>, vector<32x16xf32> -> vector<32x16xf32>
    %25 = vector.broadcast %21 : vector<32x1xf32> to vector<32x16xf32>
    %26 = arith.addf %24, %25 : vector<32x16xf32>
    %c0_26 = arith.constant 0 : index
    %c0_27 = arith.constant 0 : index
    %c0_28 = arith.constant 0 : index
    %27 = vector.load %arg9[%c0_26, %c0_27, %c0_28] : memref<1x32x16xf32, #tpu.memory_space<vmem>>, vector<1x32x16xf32>
    %28 = vector.shape_cast %27 : vector<1x32x16xf32> to vector<32x16xf32>
    %29 = vector.shape_cast %26 : vector<32x16xf32> to vector<1x32x16xf32>
    tpu.vector_store %arg9[%c0_26, %c0_27, %c0_28], %29 {strides = array<i32>} : memref<1x32x16xf32, #tpu.memory_space<vmem>>, vector<1x32x16xf32>,
    return
  }
  func.func @transform_0(%arg0: i32, %arg1: i32) -> (i32, i32, i32) {
    %c0_i32 = arith.constant 0 : i32
    %c0_i32_0 = arith.constant 0 : i32
    return %arg0, %c0_i32, %arg1 : i32, i32, i32
  }
  func.func @transform_1(%arg0: i32, %arg1: i32) -> (i32, i32, i32) {
    %c0_i32 = arith.constant 0 : i32
    %c0_i32_0 = arith.constant 0 : i32
    return %arg0, %c0_i32, %arg1 : i32, i32, i32
  }
  func.func @transform_2(%arg0: i32, %arg1: i32) -> (i32, i32, i32) {
    %c0_i32 = arith.constant 0 : i32
    %c0_i32_0 = arith.constant 0 : i32
    return %arg0, %c0_i32, %arg1 : i32, i32, i32
  }
  func.func @transform_3(%arg0: i32, %arg1: i32) -> (i32, i32) {
    %c0_i32 = arith.constant 0 : i32
    %c0_i32_0 = arith.constant 0 : i32
    %c0_i32_1 = arith.constant 0 : i32
    return %c0_i32, %c0_i32_0 : i32, i32
  }
  func.func @transform_4(%arg0: i32, %arg1: i32) -> (i32, i32) {
    %c0_i32 = arith.constant 0 : i32
    %c0_i32_0 = arith.constant 0 : i32
    %c0_i32_1 = arith.constant 0 : i32
    return %c0_i32, %c0_i32_0 : i32, i32
  }
  func.func @transform_5(%arg0: i32, %arg1: i32) -> (i32, i32, i32) {
    %c0_i32 = arith.constant 0 : i32
    %c0_i32_0 = arith.constant 0 : i32
    return %arg0, %c0_i32, %arg1 : i32, i32, i32
  }
  func.func @transform_6(%arg0: i32, %arg1: i32) -> (i32, i32, i32) {
    %c0_i32 = arith.constant 0 : i32
    %c0_i32_0 = arith.constant 0 : i32
    return %arg0, %c0_i32, %arg1 : i32, i32, i32
  }
  func.func @transform_7(%arg0: i32, %arg1: i32) -> (i32, i32, i32) {
    %c0_i32 = arith.constant 0 : i32
    %c0_i32_0 = arith.constant 0 : i32
    return %arg0, %c0_i32, %arg1 : i32, i32, i32
  }
}

</mosaic_0001>

<bundles_post_ra>
// kernel: tpu_custom_call.1
= control target key start
LH: loop header
LB: loop body
LE: loop exit
PB: predicated region body
PF: predicated region fallthrough
CT: control target
= control target key end

     0   :  { %s1001_s24 = smov 0   ;;  %s1003_s25 = smov 0   ;;  %s1168_s0 = inlined_call_operand.vmem [shape: f32[2,32,16], index: 0, kind: input, shape index: {}]   ;;  %s1169_s1 = inlined_call_operand.vmem [shape: f32[2,32,16], index: 1, kind: input, shape index: {}]   ;;  %s1170_s2 = inlined_call_operand.vmem [shape: f32[2,32,16], index: 2, kind: input, shape index: {}]   ;;  %s1171_s3 = inlined_call_operand.vmem [shape: f32[96,32], index: 3, kind: input, shape index: {}]   ;;  %s1172_s4 = inlined_call_operand.vmem [shape: f32[96,1], index: 4, kind: input, shape index: {}]   ;;  %s1173_s5 = inlined_call_operand.vmem [shape: f32[2,32,16], index: 5, kind: output, shape index: {0}]   ;;  %s1174_s6 = inlined_call_operand.vmem [shape: f32[2,32,16], index: 6, kind: output, shape index: {1}]   ;;  %s1175_s7 = inlined_call_operand.vmem [shape: f32[2,32,16], index: 7, kind: output, shape index: {2}]  }
   0x1   :  { %s1005_s26 = smov 0  }
   0x2 LB: > { %s30_s27 = sadd.s32 1, %s954_s25  ;;  %p863_p0 = scmp.ge.s32.totalorder %s958_s26, 1  ;;  %s958_s26 = sphi %s1005_s26, %s18_s26   ;;  %s954_s25 = sphi %s1003_s25, %s1177_s25   ;;  %s950_s24 = sphi %s1001_s24, %s1176_s24  }
   0x3   : > { %p32_p1 = scmp.ge.s32.totalorder %s30_s27, 2  ;;  %p295_p2 = scmp.lt.s32.totalorder %s958_s26, 3 }
   0x5   : > { %s1179_s27 = smov (%p32_p1, %s30_s27), 0  ;;  %p296_p3 = pnand %p863_p0, %p295_p2 }
   0x6   : > { %p365_p4 = scmp.lt.s32.totalorder (!%p296_p3), %s950_s24, 1 }
   0x7   : > { %299 = sbr.rel (%p296_p3) target bundleno = 179 (0xb3), region = 40 }
   0xc   : > { %v419_v0 = vld [vmem:[%s1172_s4 + $0x10] sm:$0xff]  ;;  %v417_v1 = vld [vmem:[%s1172_s4] sm:$0xff]  ;;  %v960_v2 = vmov 0   ;;  %s1181_s24 = smov (!%p365_p4, %s950_s24), 1  ;;  %v420_v10 = vld [vmem:[%s1172_s4 + $0x18] sm:$0xff]  ;;  %vm445_vm0 = vcmask 261120  }
   0xd   : > { %934 = vset.pattern.permute.xlu1 %v960_v2  ;;  %933 = vset.pattern.permute.xlu0 %v960_v2  ;;  %s1025_s9 = sshll.u32 %s1181_s24, 5  ;;  %v496_v3 = vld [vmem:[%s1172_s4 + $0x20] sm:$0xff]  ;;  %v418_v11 = vld [vmem:[%s1172_s4 + $0x8] sm:$0xff]  ;;  %v499_v23 = vld [vmem:[%s1172_s4 + $0x38] sm:$0xff]  ;;  %vm487_vm1 = vcmask 130048  }
   0xe   : > { %437 = vperm.xlu1 %934, %v419_v0   ;;  %427 = vperm.xlu0 %933, %v417_v1   ;;  %s372_s14 = scalar_lea.vmem %s1168_s0, %s1025_s9  ;;  %s380_s17 = scalar_lea.vmem %s1169_s1, %s1025_s9  ;;  %v413_v18 = vld [vmem:[%s1171_s3] sm:$0xff]  ;;  %v414_v19 = vld [vmem:[%s1171_s3 + $0x8] sm:$0xff]  ;;  %v498_v24 = vld [vmem:[%s1172_s4 + $0x30] sm:$0xff] }
   0xf   : > { %935 = vset.pattern.permute.xlu2 %v960_v2  ;;  %v424_v4 = vld [vmem:[%s372_s14 + $0x18] sm:$0xff]  ;;  %s388_s20 = scalar_lea.vmem %s1170_s2, %s1025_s9  ;;  %v423_v6 = vld [vmem:[%s372_s14 + $0x10] sm:$0xff]  ;;  %v422_v12 = vld [vmem:[%s372_s14 + $0x8] sm:$0xff]  ;;  %s1121_s30 = scalar_lea.vmem %s1173_s5, %s1025_s9 }
  0x10   : > { %506 = vperm.xlu2 %935, %v496_v3   ;;  %v503_v5 = vld [vmem:[%s380_s17 + $0x18] sm:$0xff]  ;;  %470 = vmatpush.msra.mxu0 %v424_v4  ;;  %v502_v8 = vld [vmem:[%s380_s17 + $0x10] sm:$0xff]  ;;  %v501_v13 = vld [vmem:[%s380_s17 + $0x8] sm:$0xff]  ;;  %s1127_s11 = scalar_lea.vmem %s1174_s6, %s1025_s9 }
  0x11   : > { %896 = vmatpush.msra.mxu3 %v424_v4  ;;  %v580_v7 = vld [vmem:[%s388_s20 + $0x18] sm:$0xff]  ;;  %v579_v9 = vld [vmem:[%s388_s20 + $0x10] sm:$0xff]  ;;  %900 = vmatpush.msra.mxu1 %v503_v5  ;;  %v578_v14 = vld [vmem:[%s388_s20 + $0x8] sm:$0xff] }
  0x12   : > { %904 = vmatpush.msra.mxu2 %v580_v7  ;;  %471 = vmatpush.msra.mxu0 %v423_v6  ;;  %v421_v15 = vld [vmem:[%s372_s14] sm:$0xff]  ;;  %v493_v20 = vld [vmem:[%s1171_s3 + $0x28] sm:$0xff]  ;;  %v415_v25 = vld [vmem:[%s1171_s3 + $0x10] sm:$0xff]  ;;  %s1137_s14 = scalar_lea.vmem %s1175_s7, %s1025_s9 }
  0x13   : > { %897 = vmatpush.msra.mxu3 %v423_v6  ;;  %901 = vmatpush.msra.mxu1 %v502_v8  ;;  %v500_v16 = vld [vmem:[%s380_s17] sm:$0xff]  ;;  %v570_v21 = vld [vmem:[%s1171_s3 + $0x48] sm:$0xff]  ;;  %v494_v27 = vld [vmem:[%s1171_s3 + $0x30] sm:$0xff] }
  0x14   : > { %905 = vmatpush.msra.mxu2 %v579_v9  ;;  %472 = vmatpush.msra.mxu0 %v422_v12  ;;  %v577_v17 = vld [vmem:[%s388_s20] sm:$0xff]  ;;  %v497_v22 = vld [vmem:[%s1172_s4 + $0x28] sm:$0xff]  ;;  %v571_v28 = vld [vmem:[%s1171_s3 + $0x50] sm:$0xff] }
  0x15   : > { %898 = vmatpush.msra.mxu3 %v422_v12  ;;  %902 = vmatpush.msra.mxu1 %v501_v13  ;;  %v492_v26 = vld [vmem:[%s1171_s3 + $0x20] sm:$0xff]  ;;  %v575_v29 = vld [vmem:[%s1172_s4 + $0x50] sm:$0xff]  ;;  %v574_v30 = vld [vmem:[%s1172_s4 + $0x48] sm:$0xff] }
  0x16   : > { %442 = vperm.xlu1 %934, %v420_v10   ;;  %432 = vperm.xlu0 %933, %v418_v11   ;;  %v573_v31 = vld [vmem:[%s1172_s4 + $0x40] sm:$0xff]  ;;  %v416_v32 = vld [vmem:[%s1171_s3 + $0x18] sm:$0xff] }
  0x17   : > { %906 = vmatpush.msra.mxu2 %v578_v14  ;;  %473 = vmatpush.msra.mxu0 %v421_v15  ;;  %v495_v33 = vld [vmem:[%s1171_s3 + $0x38] sm:$0xff]  ;;  %v569_v34 = vld [vmem:[%s1171_s3 + $0x40] sm:$0xff] }
  0x18   : > { %899 = vmatpush.msra.mxu3 %v421_v15  ;;  %903 = vmatpush.msra.mxu1 %v500_v16  ;;  %v572_v35 = vld [vmem:[%s1171_s3 + $0x58] sm:$0xff] }
  0x19   : > { %907 = vmatpush.msra.mxu2 %v577_v17  ;;  %876 = vmatmul.msk.f32.vlgmr.msra.gmra.mxu0 %vm445_vm0, %v413_v18  ;;  %v576_v36 = vld [vmem:[%s1172_s4 + $0x58] sm:$0xff] }
  0x1a   : > { %877 = vmatmul.msk.f32.vlgmr.msra.gmra.mxu3 %vm445_vm0, %v414_v19  ;;  %881 = vmatmul.msk.f32.vlgmr.msra.gmra.mxu1 %vm445_vm0, %v493_v20 }
  0x1b   : > { %885 = vmatmul.msk.f32.vlgmr.msra.gmra.mxu2 %vm445_vm0, %v570_v21  ;;  %548 = vmatpush.msrb.mxu0 %v503_v5 }
  0x1c   : > { %511 = vperm.xlu2 %935, %v497_v22  }
  0x1d   : > { %549 = vmatpush.msrb.mxu0 %v502_v8 }
  0x1e   : > { %521 = vperm.xlu1 %934, %v499_v23   ;;  %516 = vperm.xlu0 %933, %v498_v24  }
  0x1f   : > { %550 = vmatpush.msrb.mxu0 %v501_v13 }
  0x21   : > { %551 = vmatpush.msrb.mxu0 %v500_v16 }
  0x22   : > { %878 = vmatmul.msk.f32.gmra.mxu3 %vm445_vm0, %v415_v25  ;;  %880 = vmatmul.msk.f32.vlgmr.msrb.gmra.mxu0 %vm445_vm0, %v492_v26 }
  0x23   : > { %882 = vmatmul.msk.f32.gmra.mxu1 %vm445_vm0, %v494_v27  ;;  %886 = vmatmul.msk.f32.gmra.mxu2 %vm445_vm0, %v571_v28 }
  0x24   : > { %625 = vmatpush.msra.mxu0 %v580_v7  ;;  %583 = vperm.xlu2 %935, %v573_v31  }
  0x26   : > { %593 = vperm.xlu1 %934, %v575_v29   ;;  %588 = vperm.xlu0 %933, %v574_v30  }
  0x27   : > { %626 = vmatpush.msra.mxu0 %v579_v9 }
  0x29   : > { %627 = vmatpush.msra.mxu0 %v578_v14 }
  0x2a   : > { %879 = vmatmul.msk.f32.gmra.mxu3 %vm445_vm0, %v416_v32 }
  0x2b   : > { %628 = vmatpush.msra.mxu0 %v577_v17  ;;  %883 = vmatmul.msk.f32.gmra.mxu1 %vm445_vm0, %v495_v33 }
  0x2c   : > { %884 = vmatmul.msk.f32.vlgmr.msra.gmra.mxu0 %vm445_vm0, %v569_v34  ;;  %887 = vmatmul.msk.f32.gmra.mxu2 %vm445_vm0, %v572_v35 }
  0x2d   : > { %598 = vperm.xlu2 %935, %v576_v36  }
  0x6a   : > { %v507_v40 = vpop.permute.xlu2 %506 }
  0x76   : > { %v512_v44 = vpop.permute.xlu2 %511 }
  0x7e   : > { %v584_v58 = vpop.permute.xlu2 %583 }
  0x80   : > { %v428_v37 = vpop.permute.xlu0 %427  ;;  %v438_v38 = vpop.permute.xlu1 %437 }
  0x87   : > { %v599_v6 = vpop.permute.xlu2 %598 }
  0x88   : > { %v433_v39 = vpop.permute.xlu0 %432  ;;  %v443_v41 = vpop.permute.xlu1 %442 }
  0x90   : > { %v517_v42 = vpop.permute.xlu0 %516  ;;  %v522_v48 = vpop.permute.xlu1 %521 }
  0x96   : > { %v475_v43 = vpop.f32.mrf.mxu0 }
  0x97   : > { %v476_v45 = vadd.f32 %v475_v43, %v428_v37  ;;  %v556_v46 = vpop.f32.mrf.mxu1 }
  0x98   : > { %v557_v47 = vadd.f32 %v556_v46, %v512_v44  ;;  %v589_v50 = vpop.permute.xlu0 %588  ;;  %v594_v61 = vpop.permute.xlu1 %593 }
  0x99   : > { %488 = vst.msk [vmem:[%s1121_s30] sm:$0xff] %vm487_vm1, %v476_v45 }
  0x9a   : > { %566 = vst.msk [vmem:[%s1127_s11 + $0x8] sm:$0xff] %vm487_vm1, %v557_v47 }
  0x9d   : > { %v478_v49 = vpop.f32.mrf.mxu3 }
  0x9e   : > { %v479_v51 = vadd.f32 %v478_v49, %v433_v39  ;;  %v633_v52 = vpop.f32.mrf.mxu2 }
  0x9f   : > { %v634_v53 = vadd.f32 %v633_v52, %v589_v50  ;;  %v553_v54 = vpop.f32.mrf.mxu0 }
  0xa0   : > { %489 = vst.msk [vmem:[%s1121_s30 + $0x8] sm:$0xff] %vm487_vm1, %v479_v51  ;;  %v559_v55 = vpop.f32.mrf.mxu1  ;;  %v554_v56 = vadd.f32 %v553_v54, %v507_v40 }
  0xa1   : > { %643 = vst.msk [vmem:[%s1137_s14 + $0x8] sm:$0xff] %vm487_vm1, %v634_v53  ;;  %v560_v57 = vadd.f32 %v559_v55, %v517_v42 }
  0xa2   : > { %565 = vst.msk [vmem:[%s1127_s11] sm:$0xff] %vm487_vm1, %v554_v56 }
  0xa3   : > { %567 = vst.msk [vmem:[%s1127_s11 + $0x10] sm:$0xff] %vm487_vm1, %v560_v57 }
  0xa5   : > { %v481_v59 = vpop.f32.mrf.mxu3 }
  0xa6   : > { %v482_v60 = vadd.f32 %v481_v59, %v438_v38  ;;  %v636_v62 = vpop.f32.mrf.mxu2 }
  0xa7   : > { %v637_v63 = vadd.f32 %v636_v62, %v594_v61 }
  0xa8   : > { %490 = vst.msk [vmem:[%s1121_s30 + $0x10] sm:$0xff] %vm487_vm1, %v482_v60  ;;  %v562_v0 = vpop.f32.mrf.mxu1 }
  0xa9   : > { %v630_v1 = vpop.f32.mrf.mxu0  ;;  %v563_v2 = vadd.f32 %v562_v0, %v522_v48  ;;  %644 = vst.msk [vmem:[%s1137_s14 + $0x10] sm:$0xff] %vm487_vm1, %v637_v63 }
  0xaa   : > { %v631_v3 = vadd.f32 %v630_v1, %v584_v58 }
  0xab   : > { %568 = vst.msk [vmem:[%s1127_s11 + $0x18] sm:$0xff] %vm487_vm1, %v563_v2 }
  0xac   : > { %642 = vst.msk [vmem:[%s1137_s14] sm:$0xff] %vm487_vm1, %v631_v3 }
  0xad   : > { %v484_v4 = vpop.f32.mrf.mxu3 }
  0xae   : > { %v485_v5 = vadd.f32 %v484_v4, %v443_v41 }
  0xaf   : > { %v639_v7 = vpop.f32.mrf.mxu2 }
  0xb0   : > { %491 = vst.msk [vmem:[%s1121_s30 + $0x18] sm:$0xff] %vm487_vm1, %v485_v5  ;;  %v640_v8 = vadd.f32 %v639_v7, %v599_v6 }
  0xb2   : > { %645 = vst.msk [vmem:[%s1137_s14 + $0x18] sm:$0xff] %vm487_vm1, %v640_v8 }
  0xb3 PF: > { %s18_s26 = sadd.s32 1, %s958_s26   ;;  %s1176_s24 = smov %s954_s25 }
  0xb4   : > { %p15_p5 = scmp.ge.s32.totalorder %s18_s26, 4   ;;  %s1177_s25 = smov %s1179_s27 }
  0xb6   :  { %17 = sbr.rel (!%p15_p5) target bundleno = 2 (0x2), region = 100 }

</bundles_post_ra>
